<compile_context>
chip_gen: v7x
topology: tpu7x:2x2x1
jax: 0.10.0
libtpu: 0.0.40
codegen_flags: <defaults>
</compile_context>

<pallas_src>
import jax
import jax.numpy as jnp
from jax.experimental import pallas as pl
from jax.experimental.pallas import tpu as pltpu

HIDDEN = 768            # BERT hidden size
INTER = 32              # fc1 output size
DEFAULT_TILE_B = 512    # ~0.75 MiB bf16 per x tile -> cheap double buffering


# ---------------------------------------------------------------------------
# Kernels
# ---------------------------------------------------------------------------
def _fc_head_kernel(x_ref, w_ref, b_ref, o_ref):
    # x: (TB, 768) bf16, w: (1, 768) f32 (resident), b: (1, 1) f32 in SMEM,
    # o: (1, 1, TB) f32 (lane-dense: batch on lanes).
    x = x_ref[...].astype(jnp.float32)          # elementwise in f32 (v5e-safe)
    s = jnp.sum(x * w_ref[...], axis=-1)        # (TB,): VPU mul + lane reduce
    o_ref[...] = (s + b_ref[0, 0]).reshape(1, 1, -1).astype(o_ref.dtype)


def _rerank2_head_kernel(x_ref, w1_ref, b1_ref, w2_ref, b2_ref, o_ref):
    # x: (TB, 768) bf16, w1: (768, 32) bf16, b1: (1, 32) f32,
    # w2: (1, 32) f32, b2: (1, 1) f32 in SMEM, o: (1, 1, TB) f32.
    h = jnp.dot(x_ref[...], w1_ref[...],
                preferred_element_type=jnp.float32)          # MXU, f32 acc
    h = jnp.maximum(h + b1_ref[...], 0.0)                    # (TB, 32) ReLU
    s = jnp.sum(h * w2_ref[...], axis=-1)                    # (TB,) VPU+XLU
    o_ref[...] = (s + b2_ref[0, 0]).reshape(1, 1, -1).astype(o_ref.dtype)


# ---------------------------------------------------------------------------
# Wrapper
# ---------------------------------------------------------------------------
def _round_up(x, m):
    return ((x + m - 1) // m) * m


def text_pair_scorer_forward(cls_emb, params, rerank2=False,
                             tile_b=DEFAULT_TILE_B):
    """Replicates TextPairScorer.forward head on the CLS embedding.

    cls_emb: (B, 768) float32 (cast to bf16 internally)
    returns: (B,) float32
    """
    B, H = cls_emb.shape
    assert H == HIDDEN
    TB = tile_b if B >= tile_b else _round_up(max(B, 1), 8)
    num_tiles = pl.cdiv(B, TB)
    B_pad = num_tiles * TB

    # HBM-bandwidth-bound on x -> halve input bytes with bf16.
    x = cls_emb.astype(jnp.bfloat16)
    if B_pad != B:
        x = jnp.pad(x, ((0, B_pad - B), (0, 0)))   # padded rows sliced off below

    x_spec = pl.BlockSpec((TB, HIDDEN), lambda i: (i, 0))
    out_spec = pl.BlockSpec((1, 1, TB), lambda i: (i, 0, 0))
    out_shape = jax.ShapeDtypeStruct((num_tiles, 1, TB), jnp.float32)
    smem_spec = pl.BlockSpec(memory_space=pltpu.MemorySpace.SMEM)
    cparams = pltpu.CompilerParams(dimension_semantics=("parallel",))

    if rerank2:
        w1 = params["fc1_w"].astype(jnp.bfloat16)   # (768, 32)
        b1 = params["fc1_b"]                        # (1, 32)
        w2 = params["fc2_w"]                        # (1, 32)
        b2 = params["fc2_b"]                        # (1, 1)
        out = pl.pallas_call(
            _rerank2_head_kernel,
            out_shape=out_shape,
            grid=(num_tiles,),
            in_specs=[
                x_spec,
                pl.BlockSpec((HIDDEN, INTER), lambda i: (0, 0)),  # resident
                pl.BlockSpec((1, INTER), lambda i: (0, 0)),       # resident
                pl.BlockSpec((1, INTER), lambda i: (0, 0)),       # resident
                smem_spec,                                        # scalar bias
            ],
            out_specs=out_spec,
            compiler_params=cparams,
        )(x, w1, b1, w2, b2)
    else:
        w = params["fc_w"]                          # (1, 768)
        b = params["fc_b"]                          # (1, 1)
        out = pl.pallas_call(
            _fc_head_kernel,
            out_shape=out_shape,
            grid=(num_tiles,),
            in_specs=[
                x_spec,
                pl.BlockSpec((1, HIDDEN), lambda i: (0, 0)),      # resident
                smem_spec,                                        # scalar bias
            ],
            out_specs=out_spec,
            compiler_params=cparams,
        )(x, w, b)

    # (num_tiles, 1, TB) tiles are contiguous batch chunks -> flatten + trim,
    # replacing the PyTorch .squeeze(1).
    return out.reshape(B_pad)[:B]


def init_params(key):
    # Deterministic synthetic parameters, PyTorch nn.Linear shapes:
    #   fc.weight (1,768), fc1.weight (32,768) stored transposed as (768,32),
    #   fc2.weight (1,32).
    k1, k2, k3 = jax.random.split(key, 3)
    return {
        "fc_w": jax.random.normal(k1, (1, HIDDEN), jnp.float32) * 0.02,
        "fc_b": jnp.zeros((1, 1), jnp.float32),
        "fc1_w": jax.random.normal(k2, (HIDDEN, INTER), jnp.float32) * 0.02,
        "fc1_b": jnp.zeros((1, INTER), jnp.float32),
        "fc2_w": jax.random.normal(k3, (1, INTER), jnp.float32) * 0.02,
        "fc2_b": jnp.zeros((1, 1), jnp.float32),
    }


# ---------------------------------------------------------------------------
# Main
# ---------------------------------------------------------------------------
if __name__ == "__main__":
    key = jax.random.PRNGKey(0)
    k_emb, k_params = jax.random.split(key)

    B = 250        # deliberately not a tile multiple -> exercises padding path
    TILE_B = 128   # 2 grid steps -> exercises the pipelined batch grid
    cls_emb = jax.random.normal(k_emb, (B, HIDDEN), jnp.float32)
    params = init_params(k_params)

    out_fc = jax.block_until_ready(
        text_pair_scorer_forward(cls_emb, params, rerank2=False, tile_b=TILE_B))
    out_rr2 = jax.block_until_ready(
        text_pair_scorer_forward(cls_emb, params, rerank2=True, tile_b=TILE_B))

    # Plain-JAX reference on the same bf16-rounded inputs (f32 math).
    x32 = cls_emb.astype(jnp.bfloat16).astype(jnp.float32)
    ref_fc = jnp.sum(x32 * params["fc_w"], axis=-1) + params["fc_b"][0, 0]
    w1_32 = params["fc1_w"].astype(jnp.bfloat16).astype(jnp.float32)
    h_ref = jnp.maximum(x32 @ w1_32 + params["fc1_b"], 0.0)
    ref_rr2 = jnp.sum(h_ref * params["fc2_w"], axis=-1) + params["fc2_b"][0, 0]

    assert out_fc.shape == (B,) and out_rr2.shape == (B,)
    assert jnp.allclose(out_fc, ref_fc, atol=1e-3, rtol=1e-3)
    assert jnp.allclose(out_rr2, ref_rr2, atol=1e-3, rtol=1e-3)

    print("KERNEL_OK")
</pallas_src>

<mosaic_0001>
module attributes {stable_mosaic.version = 11 : i64} {
  func.func @_fc_head_kernel(%arg0: i32, %arg1: memref<128x768xbf16, #tpu.memory_space<vmem>>, %arg2: memref<1x768xf32, #tpu.memory_space<vmem>>, %arg3: memref<1x1xf32, #tpu.memory_space<smem>>, %arg4: memref<1x1x128xf32, #tpu.memory_space<vmem>>) attributes {dimension_semantics = [#tpu.dimension_semantics<parallel>], iteration_bounds = array<i64: 2>, scalar_prefetch = 0 : i64, scratch_operands = 0 : i64, tpu.core_type = #tpu.core_type<tc>, window_params = [{transform_indices = @transform_0, window_bounds = array<i64: 128, 768>}, {pipeline_mode = #tpu.pipeline_mode<synchronous>, transform_indices = @transform_1, window_bounds = array<i64: 1, 768>}, {transform_indices = @transform_2, window_bounds = array<i64: 1, 1>}, {transform_indices = @transform_3, window_bounds = array<i64: 1, 1, 128>}]} {
    %c0 = arith.constant 0 : index
    %c0_0 = arith.constant 0 : index
    %0 = vector.load %arg1[%c0, %c0_0] : memref<128x768xbf16, #tpu.memory_space<vmem>>, vector<128x768xbf16>
    %1 = arith.extf %0 : vector<128x768xbf16> to vector<128x768xf32>
    %c0_1 = arith.constant 0 : index
    %c0_2 = arith.constant 0 : index
    %2 = vector.load %arg2[%c0_1, %c0_2] : memref<1x768xf32, #tpu.memory_space<vmem>>, vector<1x768xf32>
    %3 = vector.broadcast %2 : vector<1x768xf32> to vector<128x768xf32>
    %4 = arith.mulf %1, %3 : vector<128x768xf32>
    %cst = arith.constant dense<0.000000e+00> : vector<128xf32>
    %5 = vector.multi_reduction <add>, %4, %cst [1] : vector<128x768xf32> to vector<128xf32>
    %c0_3 = arith.constant 0 : index
    %c0_4 = arith.constant 0 : index
    %6 = memref.load %arg3[%c0_3, %c0_4] : memref<1x1xf32, #tpu.memory_space<smem>>
    %7 = vector.broadcast %6 : f32 to vector<128xf32>
    %8 = arith.addf %5, %7 : vector<128xf32>
    %9 = vector.shape_cast %8 : vector<128xf32> to vector<1x1x128xf32>
    %c0_5 = arith.constant 0 : index
    %c0_6 = arith.constant 0 : index
    %c0_7 = arith.constant 0 : index
    %10 = vector.load %arg4[%c0_5, %c0_6, %c0_7] : memref<1x1x128xf32, #tpu.memory_space<vmem>>, vector<1x1x128xf32>
    tpu.vector_store %arg4[%c0_5, %c0_6, %c0_7], %9 {strides = array<i32>} : memref<1x1x128xf32, #tpu.memory_space<vmem>>, vector<1x1x128xf32>,
    return
  }
  func.func @transform_0(%arg0: i32) -> (i32, i32) {
    %c0_i32 = arith.constant 0 : i32
    %c0_i32_0 = arith.constant 0 : i32
    return %arg0, %c0_i32 : i32, i32
  }
  func.func @transform_1(%arg0: i32) -> (i32, i32) {
    %c0_i32 = arith.constant 0 : i32
    %c0_i32_0 = arith.constant 0 : i32
    %c0_i32_1 = arith.constant 0 : i32
    return %c0_i32, %c0_i32_0 : i32, i32
  }
  func.func @transform_2(%arg0: i32) -> (i32, i32) {
    %c0_i32 = arith.constant 0 : i32
    %c0_i32_0 = arith.constant 0 : i32
    %c0_i32_1 = arith.constant 0 : i32
    return %c0_i32, %c0_i32_0 : i32, i32
  }
  func.func @transform_3(%arg0: i32) -> (i32, i32, i32) {
    %c0_i32 = arith.constant 0 : i32
    %c0_i32_0 = arith.constant 0 : i32
    %c0_i32_1 = arith.constant 0 : i32
    return %arg0, %c0_i32, %c0_i32_0 : i32, i32, i32
  }
}

</mosaic_0001>

<bundles_post_ra>
// kernel: tpu_custom_call.1
= control target key start
LH: loop header
LB: loop body
LE: loop exit
PB: predicated region body
PF: predicated region fallthrough
CT: control target
= control target key end

     0   :  { %s1366_s0 = inlined_call_operand.hbm [shape: bf16[256,768], index: 0, kind: input, shape index: {}]   ;;  %s1367_s1 = inlined_call_operand.vmem [shape: f32[1,768], index: 1, kind: input, shape index: {}]   ;;  %s1368_s2 = inlined_call_operand.<no memory space> [shape: f32[1,1], index: 2, kind: input, shape index: {}]   ;;  %s1369_s3 = inlined_call_operand.hbm [shape: f32[2,1,128], index: 3, kind: output, shape index: {}]  }
   0x1   :  { %8 = sst [smem:[#allocation2]] %s1368_s2 }
   0x2   :  { %9 = vsyncpa [#allocation4], 0 }
   0x3   :  { %11 = vsyncpa [#allocation4 + $0x1], 0 }
   0x4   :  { %12 = vsyncpa [#allocation5], 0 }
   0x5   :  { %14 = vsyncpa [#allocation5 + $0x1], 0  ;;  %s987_s14 = smov 0   ;;  %s989_s15 = smov 0  }
   0x6   :  { %s991_s16 = smov 0   ;;  %s993_s17 = smov 0  }
   0x7 LB: > { %s1008_s2 = sadd.s32 4294967295, %s958_s17   ;;  %s801_s18 = sadd.s32 4294967294, %s958_s17   ;;  %s958_s17 = sphi %s993_s17, %s1381_s17   ;;  %s954_s16 = sphi %s991_s16, %s1380_s16   ;;  %s950_s15 = sphi %s989_s15, %s1379_s15   ;;  %s946_s14 = sphi %s987_s14, %s1378_s14  }
   0x8   : > { %s1012_s19 = sadd.s32 1, %s958_s17   ;;  %s27_s20 = sadd.s32 1, %s954_s16 }
   0x9   : > { %s24_s21 = ssub.s32 %s958_s17, %s1012_s19  ;;  %p34_p0 = scmp.ne.s32.totalorder %s954_s16, %s950_s15 }
   0xa   : > { %p25_p1 = scmp.eq.s32.totalorder %s24_s21, 0  ;;  %p35_p2 = scmp.eq.s32.totalorder %s958_s17, 0 }
   0xb   : > { %p40_p3 = scmp.ne.s32.totalorder %s950_s15, %s946_s14  ;;  %p41_p4 = scmp.eq.s32.totalorder %s1008_s2, 0 }
   0xc   : > { %s1024_s22 = scalar_select %p25_p1, %s954_s16, %s27_s20  }
   0xd   : > { %p36_p5 = por %p35_p2, %p34_p0  ;;  %p1026_p6 = por %p41_p4, %p40_p3 }
   0xe   : > { %p106_p7 = scmp.eq.s32.totalorder %s1008_s2, 1  ;;  %p112_p8 = scmp.eq.s32.totalorder %s801_s18, 1 }
   0xf   : > { %p826_p10 = scmp.lt.s32.totalorder %s958_s17, 2  ;;  %s138_s26 = sand.u32 1, %s954_s16  }
  0x10   : > { %p1033_p11 = por %p106_p7, %p34_p0  ;;  %p1037_p12 = por %p112_p8, %p40_p3 }
  0x11   : > { %s812_s27 = smul.u32 6144, %s958_s17  ;;  %p1048_p13 = pnand %p826_p10, %p36_p5 }
  0x12   : > { %s1372_s24 = scalar_select %p1033_p11, 1, 0 }
  0x13   : > { %s1373_s25 = scalar_select %p1037_p12, 1, 0 }
  0x14   : > { %s811_s28 = smul.u32 384, %s138_s26  ;;  %s1046_s4 = scalar_lea.hbm %s1366_s0, %s812_s27 }
  0x15   : > { %s1054_s8 = scalar_lea.sflag [#allocation4], %s138_s26  ;;  %s862_s9 = scalar_lea.hbm %s1046_s4, 6144 }
  0x16   : > { %s142_s6 = scalar_lea.vmem [#allocation3], %s811_s28  ;;  %p863_p0 = scmp.ne.s32.totalorder %s1046_s4, %s862_s9 }
  0x17   : > { %s150_s7 = sshll.u32 %s142_s6, 4  ;;  %p864_p1 = pneg %p1048_p13  ;;  %s1052_s7 = int_to_ptr.vmem [resolvable:$true] %s150_s7 }
  0x18   : > { %s867_s12 = scalar_lea.hbm %s1366_s0, 12288  ;;  %p868_p4 = scmp.lt.u32.totalorder %s1046_s4, %s1366_s0 }
  0x19   : > { %p865_p2 = pnand %p864_p1, %p863_p0  ;;  %p869_p5 = scmp.lt.u32.totalorder %s867_s12, %s862_s9 }
  0x1a   : > { %p871_p8 = scmp.lt.u32.totalorder %s862_s9, %s1046_s4 }
  0x1b   : > { %p866_p3 = pneg %p865_p2  ;;  %p870_p7 = por %p869_p5, %p868_p4 }
  0x1d   : > { %p872_p10 = por %p871_p8, %p870_p7 }
  0x1f   : > { %p873_p9 = pnand %p872_p10, %p866_p3 }
  0x21   : > { %876 = shalt.err (!%p873_p9)
}
  0x22   : > { %s877_s20 = scalar_lea.vmem %s1052_s7, 6144  ;;  %s960_s21 = smov [#allocation3]  }
  0x23   : > { %p878_p0 = scmp.ne.s32.totalorder %s1052_s7, %s877_s20  ;;  %s882_s26 = sshll.u32 %s960_s21, 4  ;;  %s883_s26 = int_to_ptr.vmem [resolvable:$false] %s882_s26 }
  0x24   : > { %s884_s27 = scalar_lea.vmem %s883_s26, 12288  ;;  %p885_p11 = scmp.lt.s32.totalorder %s1052_s7, %s883_s26 }
  0x25   : > { %p880_p2 = pnand %p878_p0, %p864_p1  ;;  %p886_p4 = scmp.lt.s32.totalorder %s884_s27, %s877_s20 }
  0x27   : > { %p881_p12 = pneg %p880_p2  ;;  %p887_p5 = por %p886_p4, %p885_p11 }
  0x29   : > { %p888_p7 = pnand %p887_p5, %p881_p12 }
  0x2b   : > { %891 = shalt.err (!%p888_p7)
}
  0x2c   : > { %s961_s28 = smov 384   ;;  %s962_s29 = smov 24  }
  0x2d   : > { %821 = dma.hbm_to_vmem [thread:$0]  (!%p1048_p13), %s1046_s4, 6144, %s1052_s7, %s1054_s8, %s961_s28, %s961_s28, %s962_s29  }
  0x2e   : > { %p807_p9 = scmp.ge.s32.totalorder %s958_s17, 1  ;;  %p158_p1 = scmp.lt.s32.totalorder %s958_s17, 3 }
  0x30   : > { %p159_p3 = pnand %p807_p9, %p158_p1 }
  0x31   : > { %s1085_s30 = sand.u32 (!%p159_p3), 1, %s950_s15  }
  0x32   : > { %162 = sbr.rel (%p159_p3) target bundleno = 299 (0x12b), region = 32  ;;  %s165_s9 = scalar_lea.sflag (!%p159_p3), [#allocation4], %s1085_s30 }
  0x33   : > { %s813_s6 = smul.u32 (!%p159_p3), 384, %s1085_s30 }
  0x35   : > { %s1089_s10 = scalar_lea.vmem (!%p159_p3), [#allocation3], %s813_s6 }
  0x39   : > { %937 = dma.done.wait (%p1026_p6), %s165_s9, 6144  }
  0x3a   : > { %939 = vsyncadd (%p1026_p6), %s165_s9, 4294961152  ;;  %v337_v0 = vlaneseq  ;;  %v191_v8 = vld [vmem:[%s1089_s10] sm:$0xff]  ;;  %v192_v9 = vld [vmem:[%s1089_s10 + $0x8] sm:$0xff]  ;;  %s575_s5 = sld [smem:[#allocation2]]  ;;  %vm620_vm0 = vcmask 130112   ;;  %vm627_vm1 = vcmask 195712  }
  0x3b   : > { %v193_v10 = vld [vmem:[%s1089_s10 + $0x10] sm:$0xff]  ;;  %v239_v11 = vunpack.c.l.bf16 %v191_v8  ;;  %v240_v12 = vunpack.c.h.bf16 %v191_v8  ;;  %v241_v13 = vunpack.c.l.bf16 %v192_v9  ;;  %v242_v14 = vunpack.c.h.bf16 %v192_v9  ;;  %v335_v15 = vld [vmem:[%s1367_s1] sm:$0x3f]  ;;  %v198_v25 = vld [vmem:[%s1089_s10 + $0x38] sm:$0xff]  ;;  %s808_s7 = sshll.u32 %s1008_s2, 4  ;;  %s189_s8 = scalar_lea.vmem [#allocation6], %s1085_s30 }
  0x3c   : > { %v1096_v1 = vshrl.u32 %v337_v0, 7  ;;  %v197_v16 = vld [vmem:[%s1089_s10 + $0x30] sm:$0xff]  ;;  %v243_v17 = vunpack.c.l.bf16 %v193_v10  ;;  %v244_v18 = vunpack.c.h.bf16 %v193_v10  ;;  %v199_v26 = vld [vmem:[%s1089_s10 + $0x40] sm:$0xff]  ;;  %v194_v31 = vld [vmem:[%s1089_s10 + $0x18] sm:$0xff]  ;;  %v253_v35 = vunpack.c.l.bf16 %v198_v25  ;;  %s735_s11 = sshll.u32 %s189_s8, 4  ;;  %s1322_s18 = scalar_lea.hbm %s1369_s3, %s808_s7  ;;  %s1324_s11 = int_to_ptr.vmem [resolvable:$true] %s735_s11 }
  0x3d   : > { %v251_v29 = vunpack.c.l.bf16 %v197_v16  ;;  %v252_v30 = vunpack.c.h.bf16 %v197_v16  ;;  %v254_v36 = vunpack.c.h.bf16 %v198_v25  ;;  %v255_v37 = vunpack.c.l.bf16 %v199_v26  ;;  %v195_v38 = vld [vmem:[%s1089_s10 + $0x20] sm:$0xff]  ;;  %v196_v42 = vld [vmem:[%s1089_s10 + $0x28] sm:$0xff]  ;;  %v201_v61 = vld [vmem:[%s1089_s10 + $0x50] sm:$0xff]  ;;  %s723_s20 = scalar_lea.sflag [#allocation5], %s1085_s30  ;;  %s892_s21 = scalar_lea.vmem %s1324_s11, 16 }
  0x3e   : > { %v339_v2 = vsub.s32 0, %v1096_v1  ;;  %v343_v3 = vsub.s32 1, %v1096_v1  ;;  %v347_v4 = vsub.s32 2, %v1096_v1  ;;  %v351_v5 = vsub.s32 3, %v1096_v1  ;;  %v200_v56 = vld [vmem:[%s1089_s10 + $0x48] sm:$0xff]  ;;  %p893_p6 = scmp.ne.s32.totalorder %s1324_s11, %s892_s21  ;;  %p1375_p11 = scmp.ne.s32.totalorder %s1372_s24, 0 }
  0x3f   : > { %v355_v6 = vsub.s32 4, %v1096_v1  ;;  %v359_v7 = vsub.s32 5, %v1096_v1  ;;  %v245_v43 = vunpack.c.l.bf16 %v194_v31  ;;  %v256_v46 = vunpack.c.h.bf16 %v199_v26  ;;  %s963_s2 = smov [#allocation6]  }
  0x40   : > { %v1111_v19 = vrot.slane %v335_v15, %v339_v2  ;;  %v1113_v20 = vrot.slane %v335_v15, %v343_v3  ;;  %v1115_v21 = vrot.slane %v335_v15, %v347_v4  ;;  %v1117_v22 = vrot.slane %v335_v15, %v351_v5  ;;  %v202_v4 = vld [vmem:[%s1089_s10 + $0x58] sm:$0xff]  ;;  %p894_p12 = pnand %p893_p6, %p1375_p11  ;;  %s896_s26 = sshll.u32 %s963_s2, 4  ;;  %s897_s26 = int_to_ptr.vmem [resolvable:$false] %s896_s26 }
  0x41   : > { %v1119_v23 = vrot.slane %v335_v15, %v355_v6  ;;  %v1121_v24 = vrot.slane %v335_v15, %v359_v7  ;;  %v246_v50 = vunpack.c.h.bf16 %v194_v31  ;;  %v247_v51 = vunpack.c.l.bf16 %v195_v38  ;;  %s898_s27 = scalar_lea.vmem %s897_s26, 32  ;;  %p899_p8 = scmp.lt.s32.totalorder %s1324_s11, %s897_s26 }
  0x42   : > { %v367_v27 = vmul.f32 %v1111_v19, %v239_v11  ;;  %v368_v28 = vmul.f32 %v1113_v20, %v240_v12  ;;  %v369_v32 = vmul.f32 %v1115_v21, %v241_v13  ;;  %v370_v33 = vmul.f32 %v1117_v22, %v242_v14  ;;  %v203_v13 = vld [vmem:[%s1089_s10 + $0x60] sm:$0xff]  ;;  %p895_p13 = pneg %p894_p12  ;;  %p900_p10 = scmp.lt.s32.totalorder %s898_s27, %s892_s21 }
  0x43   : > { %v371_v39 = vmul.f32 %v1119_v23, %v243_v17  ;;  %v379_v40 = vmul.f32 %v1111_v19, %v251_v29  ;;  %v380_v41 = vmul.f32 %v1113_v20, %v252_v30  ;;  %v372_v44 = vmul.f32 %v1121_v24, %v244_v18  ;;  %v204_v18 = vld [vmem:[%s1089_s10 + $0x68] sm:$0xff]  ;;  %v205_v29 = vld [vmem:[%s1089_s10 + $0x70] sm:$0xff] }
  0x44   : > { %v463_v34 = vadd.f32 %v368_v28, %v367_v27  ;;  %v381_v47 = vmul.f32 %v1115_v21, %v253_v35  ;;  %v382_v48 = vmul.f32 %v1117_v22, %v254_v36  ;;  %v383_v53 = vmul.f32 %v1119_v23, %v255_v37  ;;  %p901_p0 = por %p900_p10, %p899_p8 }
  0x45   : > { %v477_v49 = vadd.f32 %v380_v41, %v379_v40  ;;  %v248_v54 = vunpack.c.h.bf16 %v195_v38  ;;  %v249_v55 = vunpack.c.l.bf16 %v196_v42  ;;  %v373_v58 = vmul.f32 %v1111_v19, %v245_v43  ;;  %v206_v38 = vld [vmem:[%s1089_s10 + $0x78] sm:$0xff]  ;;  %v207_v43 = vld [vmem:[%s1089_s10 + $0x80] sm:$0xff] }
  0x46   : > { %v464_v45 = vadd.f32 %v463_v34, %v369_v32  ;;  %v374_v59 = vmul.f32 %v1113_v20, %v246_v50  ;;  %v375_v60 = vmul.f32 %v1115_v21, %v247_v51  ;;  %v384_v63 = vmul.f32 %v1121_v24, %v256_v46  ;;  %p902_p2 = pnand %p901_p0, %p895_p13 }
  0x47   : > { %v478_v57 = vadd.f32 %v477_v49, %v381_v47  ;;  %v250_v2 = vunpack.c.h.bf16 %v196_v42  ;;  %v376_v3 = vmul.f32 %v1117_v22, %v248_v54  ;;  %v257_v7 = vunpack.c.l.bf16 %v200_v56 }
  0x48   : > { %v465_v52 = vadd.f32 %v464_v45, %v370_v33  ;;  %v470_v6 = vadd.f32 %v374_v59, %v373_v58  ;;  %v258_v8 = vunpack.c.h.bf16 %v200_v56  ;;  %v377_v10 = vmul.f32 %v1119_v23, %v249_v55 }
  0x49   : > { %v479_v5 = vadd.f32 %v478_v57, %v382_v48  ;;  %v259_v11 = vunpack.c.l.bf16 %v201_v61  ;;  %v260_v12 = vunpack.c.h.bf16 %v201_v61  ;;  %v261_v16 = vunpack.c.l.bf16 %v202_v4  ;;  %v208_v48 = vld [vmem:[%s1089_s10 + $0x88] sm:$0xff]  ;;  %v209_v57 = vld [vmem:[%s1089_s10 + $0x90] sm:$0xff] }
  0x4a   : > { %v466_v62 = vadd.f32 %v465_v52, %v371_v39  ;;  %v471_v15 = vadd.f32 %v470_v6, %v375_v60  ;;  %v385_v17 = vmul.f32 %v1111_v19, %v257_v7  ;;  %v378_v25 = vmul.f32 %v1121_v24, %v250_v2 }
  0x4b   : > { %v480_v14 = vadd.f32 %v479_v5, %v383_v53  ;;  %v262_v26 = vunpack.c.h.bf16 %v202_v4  ;;  %v386_v27 = vmul.f32 %v1113_v20, %v258_v8  ;;  %v387_v28 = vmul.f32 %v1115_v21, %v259_v11  ;;  %v210_v4 = vld [vmem:[%s1089_s10 + $0x98] sm:$0xff]  ;;  %v211_v5 = vld [vmem:[%s1089_s10 + $0xa0] sm:$0xff] }
  0x4c   : > { %v467_v9 = vadd.f32 %v466_v62, %v372_v44  ;;  %v472_v31 = vadd.f32 %v471_v15, %v376_v3  ;;  %v388_v32 = vmul.f32 %v1117_v22, %v260_v12  ;;  %v263_v33 = vunpack.c.l.bf16 %v203_v13 }
  0x4d   : > { %v481_v30 = vadd.f32 %v480_v14, %v384_v63  ;;  %v484_v34 = vadd.f32 %v386_v27, %v385_v17  ;;  %v264_v35 = vunpack.c.h.bf16 %v203_v13  ;;  %v265_v36 = vunpack.c.l.bf16 %v204_v18 }
  0x4e   : > { %468 = vadd.xlane.f32.xlu0 %v467_v9  ;;  %v266_v37 = vunpack.c.h.bf16 %v204_v18  ;;  %v473_v39 = vadd.f32 %v472_v31, %v377_v10  ;;  %v389_v40 = vmul.f32 %v1119_v23, %v261_v16  ;;  %v267_v41 = vunpack.c.l.bf16 %v205_v29  ;;  %v212_v18 = vld [vmem:[%s1089_s10 + $0xa8] sm:$0xff] }
  0x4f   : > { %482 = vadd.xlane.f32.xlu1 %v481_v30  ;;  %v391_v42 = vmul.f32 %v1111_v19, %v263_v33  ;;  %v390_v44 = vmul.f32 %v1121_v24, %v262_v26  ;;  %v485_v45 = vadd.f32 %v484_v34, %v387_v28  ;;  %v392_v46 = vmul.f32 %v1113_v20, %v264_v35  ;;  %v214_v34 = vld [vmem:[%s1089_s10 + $0xb8] sm:$0xff] }
  0x50   : > { %v393_v47 = vmul.f32 %v1115_v21, %v265_v36  ;;  %v474_v49 = vadd.f32 %v473_v39, %v378_v25  ;;  %v268_v50 = vunpack.c.h.bf16 %v205_v29  ;;  %v394_v51 = vmul.f32 %v1117_v22, %v266_v37  ;;  %v213_v29 = vld [vmem:[%s1089_s10 + $0xb0] sm:$0xff] }
  0x51   : > { %v269_v52 = vunpack.c.l.bf16 %v206_v38  ;;  %v486_v53 = vadd.f32 %v485_v45, %v388_v32  ;;  %v491_v54 = vadd.f32 %v392_v46, %v391_v42  ;;  %v270_v55 = vunpack.c.h.bf16 %v206_v38 }
  0x52   : > { %v271_v56 = vunpack.c.l.bf16 %v207_v43  ;;  %475 = vadd.xlane.f32.xlu0 %v474_v49  ;;  %v395_v58 = vmul.f32 %v1119_v23, %v267_v41  ;;  %v272_v59 = vunpack.c.h.bf16 %v207_v43  ;;  %v273_v60 = vunpack.c.l.bf16 %v208_v48  ;;  %v215_v43 = vld [vmem:[%s1089_s10 + $0xc0] sm:$0xff] }
  0x53   : > { %v397_v61 = vmul.f32 %v1111_v19, %v269_v52  ;;  %v487_v62 = vadd.f32 %v486_v53, %v389_v40  ;;  %v492_v63 = vadd.f32 %v491_v54, %v393_v47  ;;  %v398_v2 = vmul.f32 %v1113_v20, %v270_v55  ;;  %v217_v53 = vld [vmem:[%s1089_s10 + $0xd0] sm:$0xff] }
  0x54   : > { %v399_v3 = vmul.f32 %v1115_v21, %v271_v56  ;;  %v396_v6 = vmul.f32 %v1121_v24, %v268_v50  ;;  %v274_v7 = vunpack.c.h.bf16 %v208_v48  ;;  %v400_v8 = vmul.f32 %v1117_v22, %v272_v59  ;;  %v216_v48 = vld [vmem:[%s1089_s10 + $0xc8] sm:$0xff] }
  0x55   : > { %v275_v9 = vunpack.c.l.bf16 %v209_v57  ;;  %v488_v10 = vadd.f32 %v487_v62, %v390_v44  ;;  %v493_v11 = vadd.f32 %v492_v63, %v394_v51  ;;  %v498_v12 = vadd.f32 %v398_v2, %v397_v61  ;;  %v218_v62 = vld [vmem:[%s1089_s10 + $0xd8] sm:$0xff] }
  0x56   : > { %v276_v13 = vunpack.c.h.bf16 %v209_v57  ;;  %v401_v14 = vmul.f32 %v1119_v23, %v273_v60  ;;  %v277_v15 = vunpack.c.l.bf16 %v210_v4  ;;  %v278_v16 = vunpack.c.h.bf16 %v210_v4 }
  0x57   : > { %v279_v17 = vunpack.c.l.bf16 %v211_v5  ;;  %489 = vadd.xlane.f32.xlu1 %v488_v10  ;;  %v494_v25 = vadd.f32 %v493_v11, %v395_v58  ;;  %v499_v26 = vadd.f32 %v498_v12, %v399_v3  ;;  %v403_v27 = vmul.f32 %v1111_v19, %v275_v9  ;;  %v220_v10 = vld [vmem:[%s1089_s10 + $0xe8] sm:$0xff] }
  0x58   : > { %v404_v28 = vmul.f32 %v1113_v20, %v276_v13  ;;  %v402_v30 = vmul.f32 %v1121_v24, %v274_v7  ;;  %v280_v31 = vunpack.c.h.bf16 %v211_v5  ;;  %v405_v32 = vmul.f32 %v1115_v21, %v277_v15  ;;  %v219_v5 = vld [vmem:[%s1089_s10 + $0xe0] sm:$0xff] }
  0x59   : > { %v406_v33 = vmul.f32 %v1117_v22, %v278_v16  ;;  %v495_v35 = vadd.f32 %v494_v25, %v396_v6  ;;  %v500_v36 = vadd.f32 %v499_v26, %v400_v8  ;;  %v281_v38 = vunpack.c.l.bf16 %v212_v18  ;;  %v221_v25 = vld [vmem:[%s1089_s10 + $0xf0] sm:$0xff] }
  0x5a   : > { %v505_v37 = vadd.f32 %v404_v28, %v403_v27  ;;  %v407_v39 = vmul.f32 %v1119_v23, %v279_v17  ;;  %v282_v40 = vunpack.c.h.bf16 %v212_v18  ;;  %v283_v41 = vunpack.c.l.bf16 %v213_v29 }
  0x5b   : > { %v284_v42 = vunpack.c.h.bf16 %v213_v29  ;;  %496 = vadd.xlane.f32.xlu0 %v495_v35  ;;  %v501_v44 = vadd.f32 %v500_v36, %v401_v14  ;;  %v285_v46 = vunpack.c.l.bf16 %v214_v34  ;;  %v409_v47 = vmul.f32 %v1111_v19, %v281_v38  ;;  %v223_v35 = vld [vmem:[%s1089_s10 + $0x100] sm:$0xff] }
  0x5c   : > { %v506_v45 = vadd.f32 %v505_v37, %v405_v32  ;;  %v408_v49 = vmul.f32 %v1121_v24, %v280_v31  ;;  %v286_v50 = vunpack.c.h.bf16 %v214_v34  ;;  %v410_v51 = vmul.f32 %v1113_v20, %v282_v40  ;;  %v222_v34 = vld [vmem:[%s1089_s10 + $0xf8] sm:$0xff] }
  0x5d   : > { %v411_v52 = vmul.f32 %v1115_v21, %v283_v41  ;;  %v502_v54 = vadd.f32 %v501_v44, %v402_v30  ;;  %v412_v56 = vmul.f32 %v1117_v22, %v284_v42  ;;  %v287_v57 = vunpack.c.l.bf16 %v215_v43 }
  0x5e   : > { %v507_v55 = vadd.f32 %v506_v45, %v406_v33  ;;  %v512_v58 = vadd.f32 %v410_v51, %v409_v47  ;;  %v288_v59 = vunpack.c.h.bf16 %v215_v43  ;;  %v289_v60 = vunpack.c.l.bf16 %v216_v48 }
  0x5f   : > { %v290_v61 = vunpack.c.h.bf16 %v216_v48  ;;  %503 = vadd.xlane.f32.xlu1 %v502_v54  ;;  %v413_v2 = vmul.f32 %v1119_v23, %v285_v46  ;;  %v291_v3 = vunpack.c.l.bf16 %v217_v53  ;;  %v415_v4 = vmul.f32 %v1111_v19, %v287_v57  ;;  %v224_v48 = vld [vmem:[%s1089_s10 + $0x108] sm:$0xff] }
  0x60   : > { %v508_v63 = vadd.f32 %v507_v55, %v407_v39  ;;  %v414_v6 = vmul.f32 %v1121_v24, %v286_v50  ;;  %v513_v7 = vadd.f32 %v512_v58, %v411_v52  ;;  %v416_v8 = vmul.f32 %v1113_v20, %v288_v59  ;;  %v226_v58 = vld [vmem:[%s1089_s10 + $0x118] sm:$0xff] }
  0x61   : > { %v417_v9 = vmul.f32 %v1115_v21, %v289_v60  ;;  %v292_v12 = vunpack.c.h.bf16 %v217_v53  ;;  %v418_v13 = vmul.f32 %v1117_v22, %v290_v61  ;;  %v293_v14 = vunpack.c.l.bf16 %v218_v62  ;;  %v225_v53 = vld [vmem:[%s1089_s10 + $0x110] sm:$0xff] }
  0x62   : > { %v509_v11 = vadd.f32 %v508_v63, %v408_v49  ;;  %v514_v15 = vadd.f32 %v513_v7, %v412_v56  ;;  %v519_v16 = vadd.f32 %v416_v8, %v415_v4  ;;  %v294_v17 = vunpack.c.h.bf16 %v218_v62 }
  0x63   : > { %v295_v18 = vunpack.c.l.bf16 %v219_v5  ;;  %v419_v26 = vmul.f32 %v1119_v23, %v291_v3  ;;  %v296_v27 = vunpack.c.h.bf16 %v219_v5  ;;  %v297_v28 = vunpack.c.l.bf16 %v220_v10  ;;  %v227_v5 = vld [vmem:[%s1089_s10 + $0x120] sm:$0xff] }
  0x64   : > { %510 = vadd.xlane.f32.xlu0 %v509_v11  ;;  %v421_v29 = vmul.f32 %v1111_v19, %v293_v14  ;;  %v515_v30 = vadd.f32 %v514_v15, %v413_v2  ;;  %v520_v31 = vadd.f32 %v519_v16, %v417_v9  ;;  %v422_v32 = vmul.f32 %v1113_v20, %v294_v17  ;;  %v229_v15 = vld [vmem:[%s1089_s10 + $0x130] sm:$0xff] }
  0x65   : > { %v423_v33 = vmul.f32 %v1115_v21, %v295_v18  ;;  %v420_v36 = vmul.f32 %v1121_v24, %v292_v12  ;;  %v298_v37 = vunpack.c.h.bf16 %v220_v10  ;;  %v424_v38 = vmul.f32 %v1117_v22, %v296_v27  ;;  %v228_v10 = vld [vmem:[%s1089_s10 + $0x128] sm:$0xff] }
  0x66   : > { %v299_v39 = vunpack.c.l.bf16 %v221_v25  ;;  %v516_v40 = vadd.f32 %v515_v30, %v414_v6  ;;  %v521_v41 = vadd.f32 %v520_v31, %v418_v13  ;;  %v526_v42 = vadd.f32 %v422_v32, %v421_v29  ;;  %v230_v30 = vld [vmem:[%s1089_s10 + $0x138] sm:$0xff] }
  0x67   : > { %v300_v43 = vunpack.c.h.bf16 %v221_v25  ;;  %v425_v44 = vmul.f32 %v1119_v23, %v297_v28  ;;  %v301_v45 = vunpack.c.l.bf16 %v222_v34  ;;  %v302_v46 = vunpack.c.h.bf16 %v222_v34 }
  0x68   : > { %v303_v47 = vunpack.c.l.bf16 %v223_v35  ;;  %517 = vadd.xlane.f32.xlu1 %v516_v40  ;;  %v522_v49 = vadd.f32 %v521_v41, %v419_v26  ;;  %v527_v50 = vadd.f32 %v526_v42, %v423_v33  ;;  %v427_v51 = vmul.f32 %v1111_v19, %v299_v39  ;;  %v232_v40 = vld [vmem:[%s1089_s10 + $0x148] sm:$0xff] }
  0x69   : > { %v428_v52 = vmul.f32 %v1113_v20, %v300_v43  ;;  %v426_v54 = vmul.f32 %v1121_v24, %v298_v37  ;;  %v304_v55 = vunpack.c.h.bf16 %v223_v35  ;;  %v429_v56 = vmul.f32 %v1115_v21, %v301_v45  ;;  %v231_v35 = vld [vmem:[%s1089_s10 + $0x140] sm:$0xff] }
  0x6a   : > { %v430_v57 = vmul.f32 %v1117_v22, %v302_v46  ;;  %v523_v59 = vadd.f32 %v522_v49, %v420_v36  ;;  %v528_v60 = vadd.f32 %v527_v50, %v424_v38  ;;  %v305_v62 = vunpack.c.l.bf16 %v224_v48  ;;  %v233_v49 = vld [vmem:[%s1089_s10 + $0x150] sm:$0xff] }
  0x6b   : > { %v533_v61 = vadd.f32 %v428_v52, %v427_v51  ;;  %v431_v63 = vmul.f32 %v1119_v23, %v303_v47  ;;  %v306_v2 = vunpack.c.h.bf16 %v224_v48  ;;  %v307_v3 = vunpack.c.l.bf16 %v225_v53 }
  0x6c   : > { %v308_v4 = vunpack.c.h.bf16 %v225_v53  ;;  %524 = vadd.xlane.f32.xlu0 %v523_v59  ;;  %v529_v6 = vadd.f32 %v528_v60, %v425_v44  ;;  %v309_v8 = vunpack.c.l.bf16 %v226_v58  ;;  %v433_v9 = vmul.f32 %v1111_v19, %v305_v62  ;;  %v235_v59 = vld [vmem:[%s1089_s10 + $0x160] sm:$0xff] }
  0x6d   : > { %v534_v7 = vadd.f32 %v533_v61, %v429_v56  ;;  %v432_v11 = vmul.f32 %v1121_v24, %v304_v55  ;;  %v310_v12 = vunpack.c.h.bf16 %v226_v58  ;;  %v434_v13 = vmul.f32 %v1113_v20, %v306_v2  ;;  %v234_v58 = vld [vmem:[%s1089_s10 + $0x158] sm:$0xff] }
  0x6e   : > { %v435_v14 = vmul.f32 %v1115_v21, %v307_v3  ;;  %v530_v16 = vadd.f32 %v529_v6, %v426_v54  ;;  %v436_v18 = vmul.f32 %v1117_v22, %v308_v4  ;;  %v311_v25 = vunpack.c.l.bf16 %v227_v5 }
  0x6f   : > { %v535_v17 = vadd.f32 %v534_v7, %v430_v57  ;;  %v540_v26 = vadd.f32 %v434_v13, %v433_v9  ;;  %v312_v27 = vunpack.c.h.bf16 %v227_v5  ;;  %v313_v28 = vunpack.c.l.bf16 %v228_v10 }
  0x70   : > { %v314_v29 = vunpack.c.h.bf16 %v228_v10  ;;  %531 = vadd.xlane.f32.xlu1 %v530_v16  ;;  %v437_v32 = vmul.f32 %v1119_v23, %v309_v8  ;;  %v315_v33 = vunpack.c.l.bf16 %v229_v15  ;;  %v439_v34 = vmul.f32 %v1111_v19, %v311_v25  ;;  %v236_v10 = vld [vmem:[%s1089_s10 + $0x168] sm:$0xff] }
  0x71   : > { %v536_v31 = vadd.f32 %v535_v17, %v431_v63  ;;  %v438_v36 = vmul.f32 %v1121_v24, %v310_v12  ;;  %v541_v37 = vadd.f32 %v540_v26, %v435_v14  ;;  %v440_v38 = vmul.f32 %v1113_v20, %v312_v27 }
  0x72   : > { %v441_v39 = vmul.f32 %v1115_v21, %v313_v28  ;;  %v316_v42 = vunpack.c.h.bf16 %v229_v15  ;;  %v442_v43 = vmul.f32 %v1117_v22, %v314_v29  ;;  %v317_v44 = vunpack.c.l.bf16 %v230_v30  ;;  %v237_v15 = vld [vmem:[%s1089_s10 + $0x170] sm:$0xff]  ;;  %v238_v29 = vld [vmem:[%s1089_s10 + $0x178] sm:$0xff] }
  0x73   : > { %v537_v41 = vadd.f32 %v536_v31, %v432_v11  ;;  %v542_v45 = vadd.f32 %v541_v37, %v436_v18  ;;  %v547_v46 = vadd.f32 %v440_v38, %v439_v34  ;;  %v318_v47 = vunpack.c.h.bf16 %v230_v30 }
  0x74   : > { %v319_v48 = vunpack.c.l.bf16 %v231_v35  ;;  %v443_v50 = vmul.f32 %v1119_v23, %v315_v33  ;;  %v320_v51 = vunpack.c.h.bf16 %v231_v35  ;;  %v321_v52 = vunpack.c.l.bf16 %v232_v40 }
  0x75   : > { %538 = vadd.xlane.f32.xlu0 %v537_v41  ;;  %v445_v53 = vmul.f32 %v1111_v19, %v317_v44  ;;  %v543_v54 = vadd.f32 %v542_v45, %v437_v32  ;;  %v548_v55 = vadd.f32 %v547_v46, %v441_v39  ;;  %v446_v56 = vmul.f32 %v1113_v20, %v318_v47 }
  0x76   : > { %v447_v57 = vmul.f32 %v1115_v21, %v319_v48  ;;  %v444_v60 = vmul.f32 %v1121_v24, %v316_v42  ;;  %v322_v61 = vunpack.c.h.bf16 %v232_v40  ;;  %v448_v62 = vmul.f32 %v1117_v22, %v320_v51 }
  0x77   : > { %v323_v63 = vunpack.c.l.bf16 %v233_v49  ;;  %v544_v2 = vadd.f32 %v543_v54, %v438_v36  ;;  %v549_v3 = vadd.f32 %v548_v55, %v442_v43  ;;  %v554_v4 = vadd.f32 %v446_v56, %v445_v53 }
  0x78   : > { %v324_v5 = vunpack.c.h.bf16 %v233_v49  ;;  %v449_v6 = vmul.f32 %v1119_v23, %v321_v52  ;;  %v325_v7 = vunpack.c.l.bf16 %v234_v58  ;;  %v326_v8 = vunpack.c.h.bf16 %v234_v58 }
  0x79   : > { %v327_v9 = vunpack.c.l.bf16 %v235_v59  ;;  %545 = vadd.xlane.f32.xlu1 %v544_v2  ;;  %v550_v11 = vadd.f32 %v549_v3, %v443_v50  ;;  %v555_v12 = vadd.f32 %v554_v4, %v447_v57  ;;  %v451_v13 = vmul.f32 %v1111_v19, %v323_v63 }
  0x7a   : > { %v452_v14 = vmul.f32 %v1113_v20, %v324_v5  ;;  %v450_v16 = vmul.f32 %v1121_v24, %v322_v61  ;;  %v328_v17 = vunpack.c.h.bf16 %v235_v59  ;;  %v453_v18 = vmul.f32 %v1115_v21, %v325_v7 }
  0x7b   : > { %v454_v25 = vmul.f32 %v1117_v22, %v326_v8  ;;  %v551_v26 = vadd.f32 %v550_v11, %v444_v60  ;;  %v556_v27 = vadd.f32 %v555_v12, %v448_v62  ;;  %v329_v30 = vunpack.c.l.bf16 %v236_v10 }
  0x7c   : > { %v561_v28 = vadd.f32 %v452_v14, %v451_v13  ;;  %v330_v31 = vunpack.c.h.bf16 %v236_v10  ;;  %v331_v32 = vunpack.c.l.bf16 %v237_v15  ;;  %v332_v33 = vunpack.c.h.bf16 %v237_v15 }
  0x7d   : > { %552 = vadd.xlane.f32.xlu0 %v551_v26  ;;  %v557_v34 = vadd.f32 %v556_v27, %v449_v6  ;;  %v455_v35 = vmul.f32 %v1119_v23, %v327_v9  ;;  %v457_v37 = vmul.f32 %v1111_v19, %v329_v30  ;;  %v333_v38 = vunpack.c.l.bf16 %v238_v29 }
  0x7e   : > { %v562_v36 = vadd.f32 %v561_v28, %v453_v18  ;;  %v458_v39 = vmul.f32 %v1113_v20, %v330_v31  ;;  %v459_v40 = vmul.f32 %v1115_v21, %v331_v32  ;;  %v456_v42 = vmul.f32 %v1121_v24, %v328_v17 }
  0x7f   : > { %v558_v41 = vadd.f32 %v557_v34, %v450_v16  ;;  %v334_v44 = vunpack.c.h.bf16 %v238_v29  ;;  %v460_v45 = vmul.f32 %v1117_v22, %v332_v33  ;;  %v461_v48 = vmul.f32 %v1119_v23, %v333_v38 }
  0x80   : > { %v563_v43 = vadd.f32 %v562_v36, %v454_v25  ;;  %v568_v46 = vadd.f32 %v458_v39, %v457_v37  ;;  %v1264_v22 = vand.u32 127, %v337_v0  ;;  %v1267_v57 = vstv %s575_s5 }
  0x81   : > { %559 = vadd.xlane.f32.xlu1 %v558_v41  ;;  %v462_v19 = vmul.f32 %v1121_v24, %v334_v44  ;;  %vm634_vm2 = vcmask 261312   ;;  %vm641_vm3 = vcmask 326912   ;;  %vm648_vm4 = vcmask 392512  }
  0x82   : > { %v564_v47 = vadd.f32 %v563_v43, %v455_v35  ;;  %v569_v49 = vadd.f32 %v568_v46, %v459_v40  ;;  %v615_v55 = vadd.s32 4294967288, %v1264_v22  ;;  %v622_v59 = vadd.s32 4294967280, %v1264_v22 }
  0x83   : > { %v613_v60 = vsub.s32 %v1264_v22, %v1096_v1  ;;  %v629_v0 = vadd.s32 4294967272, %v1264_v22  ;;  %v636_v5 = vadd.s32 4294967264, %v1264_v22  ;;  %v643_v10 = vadd.s32 4294967256, %v1264_v22 }
  0x84   : > { %v565_v50 = vadd.f32 %v564_v47, %v456_v42  ;;  %v570_v51 = vadd.f32 %v569_v49, %v460_v45  ;;  %v618_v24 = vsub.s32 %v615_v55, %v1096_v1  ;;  %v625_v3 = vsub.s32 %v622_v59, %v1096_v1 }
  0x85   : > { %v632_v7 = vsub.s32 %v629_v0, %v1096_v1  ;;  %v639_v13 = vsub.s32 %v636_v5, %v1096_v1  ;;  %v650_v15 = vadd.s32 4294967248, %v1264_v22  ;;  %v646_v25 = vsub.s32 %v643_v10, %v1096_v1 }
  0x86   : > { %566 = vadd.xlane.f32.xlu0 %v565_v50  ;;  %v571_v20 = vadd.f32 %v570_v51, %v461_v48  ;;  %v657_v27 = vadd.s32 4294967240, %v1264_v22  ;;  %v664_v28 = vadd.s32 4294967232, %v1264_v22  ;;  %v671_v34 = vadd.s32 4294967224, %v1264_v22 }
  0x87   : > { %v653_v30 = vsub.s32 %v650_v15, %v1096_v1  ;;  %v678_v43 = vadd.s32 4294967216, %v1264_v22  ;;  %vm655_vm5 = vcmask 458112   ;;  %vm662_vm6 = vcmask 523712  }
  0x88   : > { %v572_v21 = vadd.f32 %v571_v20, %v462_v19  ;;  %v660_v36 = vsub.s32 %v657_v27, %v1096_v1  ;;  %v667_v38 = vsub.s32 %v664_v28, %v1096_v1  ;;  %v685_v44 = vadd.s32 4294967208, %v1264_v22 }
  0x89   : > { %v692_v45 = vadd.s32 4294967200, %v1264_v22  ;;  %v674_v48 = vsub.s32 %v671_v34, %v1096_v1  ;;  %v681_v20 = vsub.s32 %v678_v43, %v1096_v1  ;;  %vm669_vm7 = vcmask 589312  }
  0x8a   : > { %573 = vadd.xlane.f32.xlu1 %v572_v21  ;;  %vm676_vm8 = vcmask 654912   ;;  %vm683_vm9 = vcmask 720512   ;;  %vm690_vm10 = vcmask 786112   ;;  %vm697_vm11 = vcmask 851712  }
  0x8b   : > { %vm704_vm12 = vcmask 917312   ;;  %vm711_vm13 = vcmask 982912   ;;  %vm718_vm14 = vcmask 1048512  }
  0xdb   : > { %v469_v52 = vpop.xlane.xlu0 %468 }
  0xdc   : > { %v483_v53 = vpop.xlane.xlu1 %482  ;;  %v577_v61 = vadd.f32 %v1267_v57, %v469_v52 }
  0xdd   : > { %v579_v4 = vadd.f32 %v1267_v57, %v483_v53  ;;  %v688_v53 = vsub.s32 %v685_v44, %v1096_v1 }
  0xde   : > { %v614_v6 = vrot.slane %v577_v61, %v613_v60  ;;  %v706_v61 = vadd.s32 4294967184, %v1264_v22 }
  0xdf   : > { %v476_v54 = vpop.xlane.xlu0 %475  ;;  %v626_v12 = vrot.slane %v579_v4, %v625_v3 }
  0xe0   : > { %v578_v58 = vadd.f32 %v1267_v57, %v476_v54  ;;  %v695_v54 = vsub.s32 %v692_v45, %v1096_v1 }
  0xe2   : > { %v619_v63 = vrot.slane %v578_v58, %v618_v24  ;;  %v699_v24 = vadd.s32 4294967192, %v1264_v22 }
  0xe4   : > { %v490_v56 = vpop.xlane.xlu1 %489  ;;  %v621_v9 = vsel %vm620_vm0, %v619_v63, %v614_v6  ;;  %v709_v6 = vsub.s32 %v706_v61, %v1096_v1 }
  0xe5   : > { %v580_v8 = vadd.f32 %v1267_v57, %v490_v56  ;;  %v628_v18 = vsel %vm627_vm1, %v626_v12, %v621_v9 }
  0xe7   : > { %v633_v16 = vrot.slane %v580_v8, %v632_v7  ;;  %v713_v8 = vadd.s32 4294967176, %v1264_v22 }
  0xe8   : > { %v497_v23 = vpop.xlane.xlu0 %496 }
  0xe9   : > { %v581_v14 = vadd.f32 %v1267_v57, %v497_v23  ;;  %v635_v32 = vsel %vm634_vm2, %v633_v16, %v628_v18 }
  0xeb   : > { %v640_v29 = vrot.slane %v581_v14, %v639_v13  ;;  %v716_v14 = vsub.s32 %v713_v8, %v1096_v1 }
  0xec   : > { %v504_v62 = vpop.xlane.xlu1 %503 }
  0xed   : > { %v582_v26 = vadd.f32 %v1267_v57, %v504_v62  ;;  %v642_v40 = vsel %vm641_vm3, %v640_v29, %v635_v32 }
  0xef   : > { %v647_v35 = vrot.slane %v582_v26, %v646_v25 }
  0xf1   : > { %v511_v2 = vpop.xlane.xlu0 %510  ;;  %v649_v46 = vsel %vm648_vm4, %v647_v35, %v642_v40 }
  0xf2   : > { %v583_v31 = vadd.f32 %v1267_v57, %v511_v2  ;;  %v702_v2 = vsub.s32 %v699_v24, %v1096_v1 }
  0xf4   : > { %v654_v41 = vrot.slane %v583_v31, %v653_v30 }
  0xf5   : > { %v518_v11 = vpop.xlane.xlu1 %517 }
  0xf6   : > { %v584_v37 = vadd.f32 %v1267_v57, %v518_v11  ;;  %v656_v19 = vsel %vm655_vm5, %v654_v41, %v649_v46 }
  0xf8   : > { %v661_v47 = vrot.slane %v584_v37, %v660_v36 }
  0xf9   : > { %v525_v17 = vpop.xlane.xlu0 %524 }
  0xfa   : > { %v585_v42 = vadd.f32 %v1267_v57, %v525_v17  ;;  %v663_v55 = vsel %vm662_vm6, %v661_v47, %v656_v19 }
  0xfc   : > { %v668_v51 = vrot.slane %v585_v42, %v667_v38 }
  0xfd   : > { %v532_v33 = vpop.xlane.xlu1 %531 }
  0xfe   : > { %v586_v49 = vadd.f32 %v1267_v57, %v532_v33  ;;  %v670_v58 = vsel %vm669_vm7, %v668_v51, %v663_v55 }
 0x100   : > { %v675_v56 = vrot.slane %v586_v49, %v674_v48 }
 0x102   : > { %v539_v39 = vpop.xlane.xlu0 %538  ;;  %v677_v62 = vsel %vm676_vm8, %v675_v56, %v670_v58 }
 0x103   : > { %v587_v21 = vadd.f32 %v1267_v57, %v539_v39 }
 0x105   : > { %v682_v59 = vrot.slane %v587_v21, %v681_v20 }
 0x106   : > { %v546_v50 = vpop.xlane.xlu1 %545 }
 0x107   : > { %v588_v23 = vadd.f32 %v1267_v57, %v546_v50  ;;  %v684_v4 = vsel %vm683_vm9, %v682_v59, %v677_v62 }
 0x109   : > { %v689_v63 = vrot.slane %v588_v23, %v688_v53 }
 0x10a   : > { %v553_v52 = vpop.xlane.xlu0 %552 }
 0x10b   : > { %v589_v60 = vadd.f32 %v1267_v57, %v553_v52  ;;  %v691_v10 = vsel %vm690_vm10, %v689_v63, %v684_v4 }
 0x10d   : > { %v696_v5 = vrot.slane %v589_v60, %v695_v54 }
 0x10e   : > { %v560_v0 = vpop.xlane.xlu1 %559 }
 0x10f   : > { %v590_v3 = vadd.f32 %v1267_v57, %v560_v0  ;;  %v698_v12 = vsel %vm697_vm11, %v696_v5, %v691_v10 }
 0x111   : > { %v703_v11 = vrot.slane %v590_v3, %v702_v2 }
 0x113   : > { %v567_v7 = vpop.xlane.xlu0 %566  ;;  %v705_v16 = vsel %vm704_vm12, %v703_v11, %v698_v12 }
 0x114   : > { %v591_v9 = vadd.f32 %v1267_v57, %v567_v7 }
 0x116   : > { %v710_v13 = vrot.slane %v591_v9, %v709_v6 }
 0x117   : > { %v574_v15 = vpop.xlane.xlu1 %573 }
 0x118   : > { %v592_v17 = vadd.f32 %v1267_v57, %v574_v15  ;;  %v712_v22 = vsel %vm711_vm13, %v710_v13, %v705_v16 }
 0x11a   : > { %v717_v18 = vrot.slane %v592_v17, %v716_v14 }
 0x11c   : > { %v719_v1 = vsel %vm718_vm14, %v717_v18, %v712_v22 }
 0x11d   : > { %721 = vst [vmem:[%s189_s8] sm:$0x1] %v719_v1 }
 0x11e   : > { %905 = shalt.err (!%p902_p2)
}
 0x11f   : > { %s906_s28 = scalar_lea.hbm %s1322_s18, 16  ;;  %s910_s6 = scalar_lea.hbm %s1369_s3, 32 }
 0x120   : > { %p907_p4 = scmp.ne.s32.totalorder %s1322_s18, %s906_s28  ;;  %p911_p9 = scmp.lt.u32.totalorder %s1322_s18, %s1369_s3 }
 0x121   : > { %p912_p1 = scmp.lt.u32.totalorder %s910_s6, %s906_s28  ;;  %p914_p6 = scmp.lt.u32.totalorder %s906_s28, %s1322_s18 }
 0x122   : > { %p908_p5 = pnand %p907_p4, %p1375_p11 }
 0x123   : > { %p913_p3 = por %p912_p1, %p911_p9 }
 0x124   : > { %p909_p7 = pneg %p908_p5 }
 0x125   : > { %p915_p12 = por %p914_p6, %p913_p3 }
 0x127   : > { %p916_p13 = pnand %p915_p12, %p909_p7 }
 0x129   : > { %919 = shalt.err (!%p916_p13)
}
 0x12a   : > { %816 = dma.vmem_to_hbm [thread:$0]  (%p1375_p11), %s1324_s11, 16, %s1322_s18, %s723_s20  }
 0x12b PF: > { %s747_s23 = sand.u32 1, %s946_s14   ;;  %p1376_p8 = scmp.ne.s32.totalorder %s1373_s25, 0 }
 0x12c   : > { %p1377_p10 = scmp.ge.s32.totalorder %s958_s17, 2  ;;  %s748_s4 = scalar_lea.sflag [#allocation5], %s747_s23 }
 0x12e   : > { %p823_p0 = pnand %p1377_p10, %p1376_p8 }
 0x130   : > { %941 = dma.done.wait (!%p823_p0), %s748_s4, 16  }
 0x131   : > { %943 = vsyncadd (!%p823_p0), %s748_s4, 4294967280  ;;  %p17_p2 = scmp.ge.s32.totalorder %s1012_s19, 4   ;;  %s1378_s14 = smov %s950_s15 }
 0x132   : > { %s1379_s15 = smov %s954_s16  ;;  %s1380_s16 = smov %s1024_s22 }
 0x133   : > { %s1381_s17 = smov %s1012_s19  ;;  %19 = sbr.rel (!%p17_p2) target bundleno = 7 (0x7), region = 77 }
 0x13a   :  { %752 = vsyncpa [#allocation4], 1 }
 0x13b   :  { %754 = vsyncpa [#allocation4 + $0x1], 1 }
 0x13c   :  { %755 = vsyncpa [#allocation5], 1 }
 0x13d   :  { %757 = vsyncpa [#allocation5 + $0x1], 1 }

</bundles_post_ra>
